<compile_context>
chip_gen: v7x
topology: tpu7x:2x2x1
jax: 0.10.0
libtpu: 0.0.40
codegen_flags: <defaults>
</compile_context>

<pallas_src>
import functools

import jax
import jax.numpy as jnp
from jax import lax
from jax.experimental import pallas as pl
from jax.experimental.pallas import tpu as pltpu

LANES = 128
SUBLANES = 8
MAX_BLOCK_ROWS = 1024  # 1024x128 f32 = 512 KiB per block


def _cdiv(a, b):
    return -(-a // b)


def _round_up(a, b):
    return _cdiv(a, b) * b


def _sngen_sum_kernel(x_ref, o_ref, *, block_rows, blocks_per_split, rows_valid):
    """Accumulate per-(sublane, lane) partial sums of one split into o_ref."""
    p = pl.program_id(0)  # split index (parallel axis -> one per TensorCore)
    i = pl.program_id(1)  # block within the split (sequential reduction axis)

    @pl.when(i == 0)
    def _init():
        o_ref[...] = jnp.zeros_like(o_ref)

    global_block = p * blocks_per_split + i
    row_start = global_block * block_rows
    in_bounds = row_start + block_rows <= rows_valid

    @pl.when(in_bounds)
    def _full_block():
        x = x_ref[...].astype(jnp.float32)
        o_ref[...] += x.reshape(block_rows // SUBLANES, SUBLANES, LANES).sum(axis=0)

    @pl.when(jnp.logical_not(in_bounds))
    def _tail_block():
        # Last (partial) block and clamped virtual blocks: mask rows that lie
        # past the real data so out-of-bounds garbage never enters the sum.
        row_ids = row_start + lax.broadcasted_iota(
            jnp.int32, (block_rows, LANES), 0)
        x = jnp.where(row_ids < rows_valid, x_ref[...].astype(jnp.float32), 0.0)
        o_ref[...] += x.reshape(block_rows // SUBLANES, SUBLANES, LANES).sum(axis=0)


def sngen_loss(neg, weight=1.0):
    """-weight * mean(neg); the hot-path reduction runs in a Pallas TPU kernel."""
    total = int(neg.size)
    flat = jnp.ravel(neg)  # native dtype; no f32 copy in the wrapper

    rows = _cdiv(total, LANES)
    if rows * LANES != total:
        # Only awkward sizes (numel % 128 != 0) pay this small zero-pad copy;
        # typical NCHW activations never hit it.
        flat = jnp.pad(flat, (0, rows * LANES - total))
    slab = flat.reshape(rows, LANES)  # free for a contiguous input

    # Two "parallel" slices so a 2-TC chip (v7x) can use both TensorCores;
    # on single-TC chips this is just a 2-iteration outer loop.
    n_split = 2 if rows > SUBLANES else 1
    block_rows = min(MAX_BLOCK_ROWS, _round_up(_cdiv(rows, n_split), SUBLANES))
    total_blocks = _cdiv(rows, block_rows)
    blocks_per_split = _cdiv(total_blocks, n_split)

    def in_index_map(p, i):
        gb = p * blocks_per_split + i
        # Clamp virtual trailing blocks (when total_blocks % n_split != 0) to a
        # valid block index; their contribution is masked to zero in-kernel.
        return (jnp.minimum(gb, total_blocks - 1), 0)

    kernel = functools.partial(
        _sngen_sum_kernel,
        block_rows=block_rows,            # static Python ints only (no traced
        blocks_per_split=blocks_per_split,  # constants captured by the kernel)
        rows_valid=rows,
    )

    partials = pl.pallas_call(
        kernel,
        out_shape=jax.ShapeDtypeStruct((n_split * SUBLANES, LANES), jnp.float32),
        grid_spec=pltpu.PrefetchScalarGridSpec(
            num_scalar_prefetch=0,
            grid=(n_split, blocks_per_split),
            in_specs=[pl.BlockSpec((block_rows, LANES), in_index_map)],
            out_specs=pl.BlockSpec((SUBLANES, LANES), lambda p, i: (p, 0)),
        ),
        compiler_params=pltpu.CompilerParams(
            dimension_semantics=("parallel", "arbitrary"),
        ),
    )(slab)

    # One tiny cross-lane reduce + the -weight/N scale on <= 8 KiB of partials.
    return (-weight / total) * jnp.sum(partials)


if __name__ == "__main__":
    key = jax.random.PRNGKey(0)
    # "neg" in deepfillv1 is the discriminator output on generated samples.
    neg = jax.random.normal(key, (2, 4, 16, 16), dtype=jnp.float32)
    weight = 1.0

    result = sngen_loss(neg, weight=weight)
    jax.block_until_ready(result)

    ref = -weight * jnp.mean(neg)
    assert jnp.allclose(result, ref, atol=1e-6, rtol=1e-6), (result, ref)

    # bf16 input (half the HBM bytes; cast to f32 happens inside the kernel).
    neg_bf16 = neg.astype(jnp.bfloat16)
    r_bf16 = sngen_loss(neg_bf16, weight=2.0)
    ref_bf16 = -2.0 * jnp.mean(neg_bf16.astype(jnp.float32))
    assert jnp.allclose(r_bf16, ref_bf16, atol=1e-5, rtol=1e-5), (r_bf16, ref_bf16)

    # Awkward size: exercises the tail-padding + in-kernel row masking path.
    neg_odd = jax.random.normal(jax.random.PRNGKey(1), (3, 5, 7, 11), jnp.float32)
    r_odd = sngen_loss(neg_odd, weight=0.5)
    ref_odd = -0.5 * jnp.mean(neg_odd)
    assert jnp.allclose(r_odd, ref_odd, atol=1e-6, rtol=1e-6), (r_odd, ref_odd)

    print("KERNEL_OK")
</pallas_src>

<mosaic_0001>
module attributes {stable_mosaic.version = 11 : i64} {
  func.func @_sngen_sum_kernel(%arg0: i32, %arg1: i32, %arg2: memref<8x128xf32, #tpu.memory_space<vmem>>, %arg3: memref<8x128xf32, #tpu.memory_space<vmem>>) attributes {dimension_semantics = [#tpu.dimension_semantics<parallel>, #tpu.dimension_semantics<arbitrary>], iteration_bounds = array<i64: 2, 1>, scalar_prefetch = 0 : i64, scratch_operands = 0 : i64, tpu.core_type = #tpu.core_type<tc>, window_params = [{transform_indices = @transform_0, window_bounds = array<i64: 8, 128>}, {transform_indices = @transform_1, window_bounds = array<i64: 8, 128>}]} {
    %c0_i32 = arith.constant 0 : i32
    %0 = arith.cmpi eq, %arg1, %c0_i32 : i32
    %1 = arith.extui %0 : i1 to i32
    %c0_i32_0 = arith.constant 0 : i32
    %2 = arith.cmpi ne, %1, %c0_i32_0 : i32
    scf.if %2 {
      %cst = arith.constant 0.000000e+00 : f32
      %13 = vector.broadcast %cst : f32 to vector<8x128xf32>
      %c0 = arith.constant 0 : index
      %c0_4 = arith.constant 0 : index
      %14 = vector.load %arg3[%c0, %c0_4] : memref<8x128xf32, #tpu.memory_space<vmem>>, vector<8x128xf32>
      tpu.vector_store %arg3[%c0, %c0_4], %13 {strides = array<i32>} : memref<8x128xf32, #tpu.memory_space<vmem>>, vector<8x128xf32>,
    } else {
    }
    %c1_i32 = arith.constant 1 : i32
    %3 = arith.muli %arg0, %c1_i32 : i32
    %4 = arith.addi %3, %arg1 : i32
    %c8_i32 = arith.constant 8 : i32
    %5 = arith.muli %4, %c8_i32 : i32
    %c8_i32_1 = arith.constant 8 : i32
    %6 = arith.addi %5, %c8_i32_1 : i32
    %c16_i32 = arith.constant 16 : i32
    %7 = arith.cmpi sle, %6, %c16_i32 : i32
    %8 = arith.extui %7 : i1 to i32
    %c0_i32_2 = arith.constant 0 : i32
    %9 = arith.cmpi ne, %8, %c0_i32_2 : i32
    scf.if %9 {
      %c0 = arith.constant 0 : index
      %c0_4 = arith.constant 0 : index
      %13 = vector.load %arg2[%c0, %c0_4] : memref<8x128xf32, #tpu.memory_space<vmem>>, vector<8x128xf32>
      %c0_5 = arith.constant 0 : index
      %c0_6 = arith.constant 0 : index
      %14 = vector.load %arg3[%c0_5, %c0_6] : memref<8x128xf32, #tpu.memory_space<vmem>>, vector<8x128xf32>
      %15 = vector.shape_cast %13 : vector<8x128xf32> to vector<1x8x128xf32>
      %cst = arith.constant dense<0.000000e+00> : vector<8x128xf32>
      %16 = vector.multi_reduction <add>, %15, %cst [0] : vector<1x8x128xf32> to vector<8x128xf32>
      %17 = arith.addf %14, %16 : vector<8x128xf32>
      %c0_7 = arith.constant 0 : index
      %c0_8 = arith.constant 0 : index
      %18 = vector.load %arg3[%c0_7, %c0_8] : memref<8x128xf32, #tpu.memory_space<vmem>>, vector<8x128xf32>
      tpu.vector_store %arg3[%c0_7, %c0_8], %17 {strides = array<i32>} : memref<8x128xf32, #tpu.memory_space<vmem>>, vector<8x128xf32>,
    } else {
    }
    %true = arith.constant true
    %10 = arith.xori %7, %true : i1
    %11 = arith.extui %10 : i1 to i32
    %c0_i32_3 = arith.constant 0 : i32
    %12 = arith.cmpi ne, %11, %c0_i32_3 : i32
    scf.if %12 {
      %13 = tpu.iota {dimensions = array<i32: 0>} : vector<8x128xi32>
      %14 = vector.broadcast %5 : i32 to vector<8x128xi32>
      %15 = arith.addi %14, %13 : vector<8x128xi32>
      %c16_i32_4 = arith.constant 16 : i32
      %16 = vector.broadcast %c16_i32_4 : i32 to vector<8x128xi32>
      %17 = arith.cmpi slt, %15, %16 : vector<8x128xi32>
      %c0 = arith.constant 0 : index
      %c0_5 = arith.constant 0 : index
      %18 = vector.load %arg2[%c0, %c0_5] : memref<8x128xf32, #tpu.memory_space<vmem>>, vector<8x128xf32>
      %cst = arith.constant 0.000000e+00 : f32
      %19 = vector.broadcast %cst : f32 to vector<8x128xf32>
      %20 = arith.select %17, %18, %19 : vector<8x128xi1>, vector<8x128xf32>
      %c0_6 = arith.constant 0 : index
      %c0_7 = arith.constant 0 : index
      %21 = vector.load %arg3[%c0_6, %c0_7] : memref<8x128xf32, #tpu.memory_space<vmem>>, vector<8x128xf32>
      %22 = vector.shape_cast %20 : vector<8x128xf32> to vector<1x8x128xf32>
      %cst_8 = arith.constant dense<0.000000e+00> : vector<8x128xf32>
      %23 = vector.multi_reduction <add>, %22, %cst_8 [0] : vector<1x8x128xf32> to vector<8x128xf32>
      %24 = arith.addf %21, %23 : vector<8x128xf32>
      %c0_9 = arith.constant 0 : index
      %c0_10 = arith.constant 0 : index
      %25 = vector.load %arg3[%c0_9, %c0_10] : memref<8x128xf32, #tpu.memory_space<vmem>>, vector<8x128xf32>
      tpu.vector_store %arg3[%c0_9, %c0_10], %24 {strides = array<i32>} : memref<8x128xf32, #tpu.memory_space<vmem>>, vector<8x128xf32>,
    } else {
    }
    return
  }
  func.func @transform_0(%arg0: i32, %arg1: i32) -> (i32, i32) {
    %c1_i32 = arith.constant 1 : i32
    %0 = arith.muli %arg0, %c1_i32 : i32
    %1 = arith.addi %0, %arg1 : i32
    %c1_i32_0 = arith.constant 1 : i32
    %2 = arith.minsi %1, %c1_i32_0 : i32
    %c0_i32 = arith.constant 0 : i32
    %c0_i32_1 = arith.constant 0 : i32
    return %2, %c0_i32 : i32, i32
  }
  func.func @transform_1(%arg0: i32, %arg1: i32) -> (i32, i32) {
    %c0_i32 = arith.constant 0 : i32
    %c0_i32_0 = arith.constant 0 : i32
    return %arg0, %c0_i32 : i32, i32
  }
}

</mosaic_0001>

<bundles_post_ra>
// kernel: tpu_custom_call.1
= control target key start
LH: loop header
LB: loop body
LE: loop exit
PB: predicated region body
PF: predicated region fallthrough
CT: control target
= control target key end

     0   :  { %6 = vsyncpa [#allocation3], 0  ;;  %s737_s0 = inlined_call_operand.hbm [shape: f32[16,128], index: 0, kind: input, shape index: {}]   ;;  %s738_s1 = inlined_call_operand.hbm [shape: f32[16,128], index: 1, kind: output, shape index: {}]  }
   0x1   :  { %8 = vsyncpa [#allocation3 + $0x1], 0 }
   0x2   :  { %9 = vsyncpa [#allocation4], 0 }
   0x3   :  { %11 = vsyncpa [#allocation4 + $0x1], 0  ;;  %s534_s6 = smov 0   ;;  %s536_s7 = smov 0  }
   0x4   :  { %s538_s8 = smov 0   ;;  %s540_s9 = smov 0  }
   0x5   :  { %s542_s10 = smov 0   ;;  %s544_s11 = smov 0  }
   0x6   :  { %s546_s12 = smov 0   ;;  %s548_s13 = smov 0  }
   0x7   :  { %s550_s14 = smov 0  }
   0x8 LB: > { %s280_s15 = sadd.s32 4294967295, %s519_s14   ;;  %s281_s16 = sadd.s32 4294967294, %s519_s14   ;;  %s519_s14 = sphi %s550_s14, %s17_s14   ;;  %s515_s13 = sphi %s548_s13, %s757_s13   ;;  %s511_s12 = sphi %s546_s12, %s756_s12   ;;  %s507_s11 = sphi %s544_s11, %s755_s11   ;;  %s503_s10 = sphi %s542_s10, %s754_s10   ;;  %s499_s9 = sphi %s540_s9, %s753_s9   ;;  %s495_s8 = sphi %s538_s8, %s752_s8   ;;  %s491_s7 = sphi %s536_s7, %s751_s7   ;;  %s487_s6 = sphi %s534_s6, %s750_s6  }
   0x9   : > { %s29_s17 = sadd.s32 1, %s515_s13  ;;  %p34_p0 = scmp.lt.s32.totalorder %s515_s13, 1 }
   0xa   : > { %p31_p1 = scmp.ge.s32.totalorder %s29_s17, 2  ;;  %s42_s18 = sadd.s32 1, %s507_s11 }
   0xb   : > { %s583_s19 = scalar_select %p34_p0, %s515_s13, 1 }
   0xc   : > { %s759_s17 = smov (%p31_p1, %s29_s17), 0  ;;  %p49_p2 = scmp.ne.s32.totalorder %s507_s11, %s503_s10 }
   0xd   : > { %p50_p3 = scmp.eq.s32.totalorder %s519_s14, 0  ;;  %p37_p4 = scmp.lt.s32.totalorder %s759_s17, 1 }
   0xe   : > { %p55_p5 = scmp.ne.s32.totalorder %s503_s10, %s499_s9  ;;  %p56_p7 = scmp.eq.s32.totalorder %s280_s15, 0 }
   0xf   : > { %p592_p6 = por %p50_p3, %p49_p2  ;;  %s65_s23 = ssub.s32 %s515_s13, %s759_s17 }
  0x10   : > { %s38_s21 = scalar_select %p37_p4, %s759_s17, 1 }
  0x11   : > { %p597_p8 = por %p56_p7, %p55_p5  ;;  %p66_p9 = scmp.eq.s32.totalorder %s65_s23, 0 }
  0x12   : > { %s39_s24 = ssub.s32 %s583_s19, %s38_s21  ;;  %s68_s25 = sadd.s32 1, %s495_s8 }
  0x13   : > { %p40_p10 = scmp.eq.s32.totalorder %s39_s24, 0  ;;  %p78_p11 = scmp.ne.s32.totalorder %s495_s8, %s491_s7 }
  0x14   : > { %s606_s26 = scalar_select %p66_p9, %s495_s8, %s68_s25  }
  0x15   : > { %s609_s27 = scalar_select %p40_p10, %s507_s11, %s42_s18  }
  0x16   : > { %p79_p12 = scmp.eq.s32.totalorder %s280_s15, 1  ;;  %p84_p13 = scmp.ne.s32.totalorder %s491_s7, %s487_s6 }
  0x17   : > { %p85_p0 = scmp.eq.s32.totalorder %s281_s16, 1  ;;  %p308_p4 = scmp.lt.s32.totalorder %s519_s14, 2 }
  0x18   : > { %p615_p1 = por %p79_p12, %p78_p11  ;;  %s105_s30 = sand.u32 1, %s507_s11  }
  0x19   : > { %p620_p3 = por %p85_p0, %p84_p13  ;;  %s285_s2 = sshll.u32 %s583_s19, 7 }
  0x1a   : > { %s742_s28 = scalar_select %p615_p1, 1, 0 }
  0x1b   : > { %s743_s29 = scalar_select %p620_p3, 1, 0 }
  0x1c   : > { %s284_s3 = sshll.u32 %s105_s30, 3  ;;  %s630_s9 = scalar_lea.hbm %s737_s0, %s285_s2 }
  0x1d   : > { %s109_s15 = scalar_lea.vmem [#allocation2], %s284_s3  ;;  %p634_p5 = pnand %p308_p4, %p592_p6 }
  0x1e   : > { %s119_s16 = sshll.u32 %s109_s15, 4  ;;  %s106_s19 = scalar_lea.sflag [#allocation3], %s105_s30  ;;  %s638_s16 = int_to_ptr.vmem [resolvable:$true] %s119_s16 }
  0x1f   : > { %s383_s21 = scalar_lea.hbm %s630_s9, 128  ;;  %p385_p11 = pneg %p634_p5 }
  0x20   : > { %p384_p10 = scmp.ne.s32.totalorder %s630_s9, %s383_s21  ;;  %s388_s24 = scalar_lea.hbm %s737_s0, 256 }
  0x21   : > { %p389_p6 = scmp.lt.u32.totalorder %s630_s9, %s737_s0  ;;  %p390_p0 = scmp.lt.u32.totalorder %s388_s24, %s383_s21 }
  0x22   : > { %p386_p12 = pnand %p385_p11, %p384_p10  ;;  %p392_p2 = scmp.lt.u32.totalorder %s383_s21, %s630_s9 }
  0x23   : > { %p391_p4 = por %p390_p0, %p389_p6 }
  0x24   : > { %p387_p13 = pneg %p386_p12 }
  0x25   : > { %p393_p7 = por %p392_p2, %p391_p4 }
  0x27   : > { %p394_p9 = pnand %p393_p7, %p387_p13 }
  0x29   : > { %397 = shalt.err (!%p394_p9)
}
  0x2a   : > { %s398_s30 = scalar_lea.vmem %s638_s16, 128  ;;  %s521_s3 = smov [#allocation2]  }
  0x2b   : > { %p399_p10 = scmp.ne.s32.totalorder %s638_s16, %s398_s30  ;;  %s403_s4 = sshll.u32 %s521_s3, 4  ;;  %s404_s4 = int_to_ptr.vmem [resolvable:$false] %s403_s4 }
  0x2c   : > { %s405_s5 = scalar_lea.vmem %s404_s4, 256  ;;  %p406_p1 = scmp.lt.s32.totalorder %s638_s16, %s404_s4 }
  0x2d   : > { %p401_p12 = pnand %p399_p10, %p385_p11  ;;  %p407_p6 = scmp.lt.s32.totalorder %s405_s5, %s398_s30 }
  0x2f   : > { %p402_p3 = pneg %p401_p12  ;;  %p408_p0 = por %p407_p6, %p406_p1 }
  0x31   : > { %p409_p2 = pnand %p408_p0, %p402_p3 }
  0x33   : > { %412 = shalt.err (!%p409_p2)
}
  0x34   : > { %303 = dma.hbm_to_vmem [thread:$0]  (!%p634_p5), %s630_s9, 128, %s638_s16, %s106_s19  }
  0x35   : > { %p745_p7 = scmp.lt.s32.totalorder %s519_s14, 3  ;;  %p746_p9 = scmp.ge.s32.totalorder %s519_s14, 1 }
  0x37   : > { %p125_p11 = pnand %p746_p9, %p745_p7 }
  0x38   : > { %s130_s15 = sand.u32 (!%p125_p11), 1, %s503_s10  }
  0x39   : > { %128 = sbr.rel (%p125_p11) target bundleno = 116 (0x74), region = 24  ;;  %s287_s21 = sshll.u32 (!%p125_p11), %s130_s15, 3 }
  0x3a   : > { %s131_s20 = scalar_lea.sflag (!%p125_p11), [#allocation3], %s130_s15  ;;  %s134_s23 = scalar_lea.vmem (!%p125_p11), [#allocation2], %s287_s21 }
  0x40   : > { %478 = dma.done.wait (%p597_p8), %s131_s20, 128  }
  0x41   : > { %480 = vsyncadd (%p597_p8), %s131_s20, 4294967168  ;;  %s150_s18 = sand.u32 1, %s491_s7   ;;  %s289_s9 = sshll.u32 %s511_s12, 3  ;;  %v522_v0 = vmov 0.0  }
  0x42   : > { %s288_s16 = sshll.u32 %s150_s18, 3  ;;  %s163_s19 = sadd.s32 8, %s289_s9 }
  0x43   : > { %s152_s24 = scalar_lea.vmem [#allocation5], %s288_s16  ;;  %p290_p1 = scmp.gt.s32.totalorder %s163_s19, 16 }
  0x44   : > { %160 = vst [vmem:[%s152_s24] sm:$0xff] %v522_v0  ;;  %v168_v1 = vld [vmem:[%s134_s23] sm:$0xff] (!%p290_p1) }
  0x45   : > { %167 = sbr.rel (%p290_p1) target bundleno = 79 (0x4f), region = 36 }
  0x4b   : > { %v169_v2 = vld [vmem:[%s152_s24] sm:$0xff] (!%p290_p1) }
  0x4c   : > { %v171_v3 = vadd.f32 %v169_v2, %v168_v1 }
  0x4e   : > { %172 = vst [vmem:[%s152_s24] sm:$0xff] %v171_v3 }
  0x4f PF: > { %p291_p3 = scmp.le.s32.totalorder %s163_s19, 16 }
  0x50   : > { %v177_v4 = vlaneseq (!%p291_p3)  ;;  %v179_v5 = vstv (!%p291_p3), %s289_s9  ;;  %v182_v8 = vld [vmem:[%s134_s23] sm:$0xff] (!%p291_p3) }
  0x51   : > { %176 = sbr.rel (%p291_p3) target bundleno = 91 (0x5b), region = 40 }
  0x52   : > { %v178_v6 = vshrl.u32 (!%p291_p3), %v177_v4, 7 }
  0x54   : > { %v180_v7 = vadd.s32 (!%p291_p3), %v179_v5, %v178_v6 }
  0x55   : > { %v184_v9 = vld [vmem:[%s152_s24] sm:$0xff] (!%p291_p3) }
  0x56   : > { %vm181_vm0 = vcmp.lt.s32.totalorder (!%p291_p3), %v180_v7, 16 }
  0x57   : > { %v183_v10 = vsel (!%p291_p3), %vm181_vm0, %v182_v8, 0.0 }
  0x58   : > { %v186_v11 = vadd.f32 %v184_v9, %v183_v10 }
  0x5a   : > { %187 = vst [vmem:[%s152_s24] sm:$0xff] %v186_v11 }
  0x5b PF: > { %s293_s22 = sshll.u32 %s511_s12, 7  ;;  %s202_s3 = sshll.u32 %s152_s24, 4  ;;  %s203_s3 = int_to_ptr.vmem [resolvable:$true] %s202_s3 }
  0x5c   : > { %s684_s30 = scalar_lea.hbm %s738_s1, %s293_s22  ;;  %s189_s4 = scalar_lea.sflag [#allocation4], %s150_s18 }
  0x5d   : > { %s413_s5 = scalar_lea.vmem %s203_s3, 128  ;;  %p747_p5 = scmp.ne.s32.totalorder %s742_s28, 0 }
  0x5e   : > { %p414_p8 = scmp.ne.s32.totalorder %s203_s3, %s413_s5  ;;  %s523_s15 = smov [#allocation5]  }
  0x5f   : > { %s417_s21 = sshll.u32 %s523_s15, 4  ;;  %s418_s21 = int_to_ptr.vmem [resolvable:$false] %s417_s21 }
  0x60   : > { %p415_p13 = pnand %p414_p8, %p747_p5  ;;  %s419_s20 = scalar_lea.vmem %s418_s21, 256 }
  0x61   : > { %p420_p10 = scmp.lt.s32.totalorder %s203_s3, %s418_s21  ;;  %p421_p12 = scmp.lt.s32.totalorder %s419_s20, %s413_s5 }
  0x62   : > { %p416_p4 = pneg %p415_p13 }
  0x63   : > { %p422_p6 = por %p421_p12, %p420_p10 }
  0x65   : > { %p423_p0 = pnand %p422_p6, %p416_p4 }
  0x67   : > { %426 = shalt.err (!%p423_p0)
}
  0x68   : > { %s427_s12 = scalar_lea.hbm %s684_s30, 128  ;;  %s431_s9 = scalar_lea.hbm %s738_s1, 256 }
  0x69   : > { %p428_p2 = scmp.ne.s32.totalorder %s684_s30, %s427_s12  ;;  %p432_p11 = scmp.lt.u32.totalorder %s684_s30, %s738_s1 }
  0x6a   : > { %p433_p1 = scmp.lt.u32.totalorder %s431_s9, %s427_s12  ;;  %p435_p8 = scmp.lt.u32.totalorder %s427_s12, %s684_s30 }
  0x6b   : > { %p429_p7 = pnand %p428_p2, %p747_p5 }
  0x6c   : > { %p434_p3 = por %p433_p1, %p432_p11 }
  0x6d   : > { %p430_p9 = pneg %p429_p7 }
  0x6e   : > { %p436_p13 = por %p435_p8, %p434_p3 }
  0x70   : > { %p437_p4 = pnand %p436_p13, %p430_p9 }
  0x72   : > { %440 = shalt.err (!%p437_p4)
}
  0x73   : > { %298 = dma.vmem_to_hbm [thread:$0]  (%p747_p5), %s203_s3, 128, %s684_s30, %s189_s4  }
  0x74 PF: > { %s214_s24 = sand.u32 1, %s487_s6   ;;  %p748_p10 = scmp.ne.s32.totalorder %s743_s29, 0 }
  0x75   : > { %p749_p12 = scmp.ge.s32.totalorder %s519_s14, 2  ;;  %s215_s22 = scalar_lea.sflag [#allocation4], %s214_s24 }
  0x77   : > { %p305_p6 = pnand %p749_p12, %p748_p10 }
  0x79   : > { %482 = dma.done.wait (!%p305_p6), %s215_s22, 128  }
  0x7a   : > { %484 = vsyncadd (!%p305_p6), %s215_s22, 4294967168  ;;  %s17_s14 = sadd.s32 1, %s519_s14   ;;  %s750_s6 = smov %s491_s7 }
  0x7b   : > { %p14_p0 = scmp.ge.s32.totalorder %s17_s14, 4   ;;  %s751_s7 = smov %s495_s8 }
  0x7c   : > { %s752_s8 = smov %s606_s26  ;;  %s753_s9 = smov %s503_s10 }
  0x7d   : > { %s754_s10 = smov %s507_s11  ;;  %s755_s11 = smov %s609_s27 }
  0x7e   : > { %s756_s12 = smov %s515_s13  ;;  %s757_s13 = smov %s759_s17 }
  0x7f   :  { %16 = sbr.rel (!%p14_p0) target bundleno = 8 (0x8), region = 81 }
  0x86   :  { %220 = vsyncpa [#allocation3], 1 }
  0x87   :  { %222 = vsyncpa [#allocation3 + $0x1], 1 }
  0x88   :  { %223 = vsyncpa [#allocation4], 1 }
  0x89   :  { %225 = vsyncpa [#allocation4 + $0x1], 1 }

</bundles_post_ra>
